<compile_context>
chip_gen: v7x
topology: tpu7x:2x2x1
jax: 0.10.0
libtpu: 0.0.40
codegen_flags: <defaults>
</compile_context>

<pallas_src>
import jax
import jax.numpy as jnp
from jax.experimental import pallas as pl
from jax.experimental.pallas import tpu as pltpu


def make_inception_kernel(H, W, Wp):
    """Kernel factory; H, W are output spatial dims, Wp = W + 6 (padded width)."""
    HW = H * W
    HWp = H * Wp

    def kernel(x_ref, w1_ref, s1_ref, b1_ref, w2_ref, s2_ref, b2_ref, o_ref):
        # x_ref : (1, Cin, Lp)  flat spatially padded input, Lp = (H+7)*(W+6)
        # w*_ref: (C2, 9*Cin)   flattened conv weights, tap-major
        # s*,b* : (C2, 1)       fused BN scale / shift (includes conv bias)
        # o_ref : (1, 2*C2, H*W) lane-dense concatenated output
        x = x_ref[0]                                      # (Cin, Lp), one load

        def branch(w_ref, s_ref, b_ref, base, dil):
            # im2col via 9 statically shifted views of the flat padded row.
            parts = []
            for kh in range(3):
                for kw in range(3):
                    start = base * (Wp + 1) + dil * (kh * Wp + kw)
                    parts.append(x[:, start:start + HWp])
            p = jnp.concatenate(parts, axis=0)            # (9*Cin, H*Wp)

            # Single MXU matmul per branch, K = 9*Cin.
            y = jnp.dot(w_ref[...], p,
                        preferred_element_type=jnp.float32)  # (C2, H*Wp)

            # Drop the horizontal halo columns -> lane-dense (C2, H*W).
            y = jnp.concatenate(
                [y[:, h * Wp:h * Wp + W] for h in range(H)], axis=1)

            y = y * s_ref[...] + b_ref[...]               # conv bias + BN (folded)
            return jnp.where(y >= 0, y, 0.2 * y)          # LeakyReLU(0.2)

        # branch 1: kernel 3, pad 1, dil 1  -> base offset 2 inside the pad-3 buffer
        y1 = branch(w1_ref, s1_ref, b1_ref, base=2, dil=1)
        # branch 2: kernel 3, pad 3, dil 3  -> base offset 0
        y2 = branch(w2_ref, s2_ref, b2_ref, base=0, dil=3)

        # One dense (Cout, H*W) store for the whole block.
        o_ref[0] = jnp.concatenate([y1, y2], axis=0).astype(o_ref.dtype)

    return kernel


def inception_block_pallas(x, params):
    """x: (N, Cin, H, W) float32. params: dict of weights / fused BN terms."""
    N, Cin, H, W = x.shape
    w1, s1, b1 = params["w1"], params["s1"], params["b1"]
    w2, s2, b2 = params["w2"], params["s2"], params["b2"]
    C2 = w1.shape[0]
    Cout = 2 * C2
    HW = H * W

    pad = 3
    Wp = W + 2 * pad
    Hp = H + 2 * pad + 1     # one extra bottom row keeps every tap slab
                             # [start, start + H*Wp) in bounds
    Lp = Hp * Wp

    x_pad = jnp.pad(x, ((0, 0), (0, 0), (pad, pad + 1), (pad, pad)))
    x_flat = x_pad.reshape(N, Cin, Lp)

    # Lane/sublane-dense weight layout: (C2, 9*Cin), tap-major
    # (flat index = (kh*3 + kw)*Cin + ci, matching the kernel's im2col order).
    wf1 = jnp.transpose(w1, (0, 2, 3, 1)).reshape(C2, 9 * Cin)
    wf2 = jnp.transpose(w2, (0, 2, 3, 1)).reshape(C2, 9 * Cin)

    kernel = make_inception_kernel(H, W, Wp)

    full = lambda shape: pl.BlockSpec(shape, lambda n: (0,) * len(shape))

    out_flat = pl.pallas_call(
        kernel,
        out_shape=jax.ShapeDtypeStruct((N, Cout, HW), jnp.float32),
        grid_spec=pltpu.PrefetchScalarGridSpec(
            num_scalar_prefetch=0,
            grid=(N,),
            in_specs=[
                pl.BlockSpec((1, Cin, Lp), lambda n: (n, 0, 0)),
                full((C2, 9 * Cin)),
                full((C2, 1)),
                full((C2, 1)),
                full((C2, 9 * Cin)),
                full((C2, 1)),
                full((C2, 1)),
            ],
            out_specs=pl.BlockSpec((1, Cout, HW), lambda n: (n, 0, 0)),
        ),
        compiler_params=pltpu.CompilerParams(
            dimension_semantics=("parallel",),
            vmem_limit_bytes=48 * 1024 * 1024,
        ),
    )(x_flat, wf1, s1, b1, wf2, s2, b2)

    return out_flat.reshape(N, Cout, H, W)


def make_params(key, in_channels, out_channels):
    """Deterministic synthetic parameters (Conv2d + BatchNorm2d, eval mode)."""
    C2 = out_channels // 2
    ks = jax.random.split(key, 12)
    eps = 1e-5

    def branch_params(kw, kb, kg, kbeta, kmean, kvar):
        w = jax.random.normal(kw, (C2, in_channels, 3, 3), jnp.float32) * 0.1
        bias = jax.random.normal(kb, (C2,), jnp.float32) * 0.1
        gamma = 1.0 + 0.1 * jax.random.normal(kg, (C2,), jnp.float32)
        beta = 0.1 * jax.random.normal(kbeta, (C2,), jnp.float32)
        mean = 0.1 * jax.random.normal(kmean, (C2,), jnp.float32)
        var = jnp.abs(jax.random.normal(kvar, (C2,), jnp.float32)) + 0.5
        scale = gamma / jnp.sqrt(var + eps)
        shift = beta + scale * (bias - mean)
        return w, scale.reshape(C2, 1), shift.reshape(C2, 1)

    w1, s1, b1 = branch_params(*ks[0:6])
    w2, s2, b2 = branch_params(*ks[6:12])
    return {"w1": w1, "s1": s1, "b1": b1, "w2": w2, "s2": s2, "b2": b2}


def reference(x, params):
    """Pure-JAX reference of the PyTorch forward (BN in eval mode)."""
    def conv(x, w, padding, dilation):
        return jax.lax.conv_general_dilated(
            x, w, window_strides=(1, 1),
            padding=((padding, padding), (padding, padding)),
            rhs_dilation=(dilation, dilation),
            dimension_numbers=("NCHW", "OIHW", "NCHW"))

    def branch(w, s, b, padding, dilation):
        y = conv(x, w, padding, dilation)
        y = y * s[None, :, :, None] + b[None, :, :, None]  # s,b are (C2,1)
        return jnp.where(y >= 0, y, 0.2 * y)

    y1 = branch(params["w1"], params["s1"], params["b1"], 1, 1)
    y2 = branch(params["w2"], params["s2"], params["b2"], 3, 3)
    return jnp.concatenate([y1, y2], axis=1)


if __name__ == "__main__":
    key = jax.random.PRNGKey(0)
    kx, kp = jax.random.split(key)

    N, Cin, H, W = 2, 4, 16, 16
    Cout = 8

    x = jax.random.normal(kx, (N, Cin, H, W), jnp.float32)
    params = make_params(kp, Cin, Cout)

    out = inception_block_pallas(x, params)
    out = jax.block_until_ready(out)

    ref = reference(x, params)
    assert out.shape == (N, Cout, H, W)
    assert jnp.allclose(out, ref, rtol=1e-4, atol=1e-4), (
        float(jnp.max(jnp.abs(out - ref))))

    print("KERNEL_OK")
</pallas_src>

<mosaic_0001>
module attributes {stable_mosaic.version = 11 : i64} {
  func.func @kernel(%arg0: i32, %arg1: memref<1x4x506xf32, #tpu.memory_space<vmem>>, %arg2: memref<4x36xf32, #tpu.memory_space<vmem>>, %arg3: memref<4x1xf32, #tpu.memory_space<vmem>>, %arg4: memref<4x1xf32, #tpu.memory_space<vmem>>, %arg5: memref<4x36xf32, #tpu.memory_space<vmem>>, %arg6: memref<4x1xf32, #tpu.memory_space<vmem>>, %arg7: memref<4x1xf32, #tpu.memory_space<vmem>>, %arg8: memref<1x8x256xf32, #tpu.memory_space<vmem>>) attributes {dimension_semantics = [#tpu.dimension_semantics<parallel>], iteration_bounds = array<i64: 2>, scalar_prefetch = 0 : i64, scratch_operands = 0 : i64, tpu.core_type = #tpu.core_type<tc>, window_params = [{transform_indices = @transform_0, window_bounds = array<i64: 1, 4, 506>}, {pipeline_mode = #tpu.pipeline_mode<synchronous>, transform_indices = @transform_1, window_bounds = array<i64: 4, 36>}, {pipeline_mode = #tpu.pipeline_mode<synchronous>, transform_indices = @transform_2, window_bounds = array<i64: 4, 1>}, {pipeline_mode = #tpu.pipeline_mode<synchronous>, transform_indices = @transform_3, window_bounds = array<i64: 4, 1>}, {pipeline_mode = #tpu.pipeline_mode<synchronous>, transform_indices = @transform_4, window_bounds = array<i64: 4, 36>}, {pipeline_mode = #tpu.pipeline_mode<synchronous>, transform_indices = @transform_5, window_bounds = array<i64: 4, 1>}, {pipeline_mode = #tpu.pipeline_mode<synchronous>, transform_indices = @transform_6, window_bounds = array<i64: 4, 1>}, {transform_indices = @transform_7, window_bounds = array<i64: 1, 8, 256>}]} {
    %c0 = arith.constant 0 : index
    %c0_0 = arith.constant 0 : index
    %c0_1 = arith.constant 0 : index
    %0 = vector.load %arg1[%c0, %c0_0, %c0_1] : memref<1x4x506xf32, #tpu.memory_space<vmem>>, vector<1x4x506xf32>
    %1 = vector.shape_cast %0 : vector<1x4x506xf32> to vector<4x506xf32>
    %2 = vector.extract_strided_slice %1 {offsets = [0, 46], sizes = [4, 352], strides = [1, 1]} : vector<4x506xf32> to vector<4x352xf32>
    %3 = vector.extract_strided_slice %1 {offsets = [0, 47], sizes = [4, 352], strides = [1, 1]} : vector<4x506xf32> to vector<4x352xf32>
    %4 = vector.extract_strided_slice %1 {offsets = [0, 48], sizes = [4, 352], strides = [1, 1]} : vector<4x506xf32> to vector<4x352xf32>
    %5 = vector.extract_strided_slice %1 {offsets = [0, 68], sizes = [4, 352], strides = [1, 1]} : vector<4x506xf32> to vector<4x352xf32>
    %6 = vector.extract_strided_slice %1 {offsets = [0, 69], sizes = [4, 352], strides = [1, 1]} : vector<4x506xf32> to vector<4x352xf32>
    %7 = vector.extract_strided_slice %1 {offsets = [0, 70], sizes = [4, 352], strides = [1, 1]} : vector<4x506xf32> to vector<4x352xf32>
    %8 = vector.extract_strided_slice %1 {offsets = [0, 90], sizes = [4, 352], strides = [1, 1]} : vector<4x506xf32> to vector<4x352xf32>
    %9 = vector.extract_strided_slice %1 {offsets = [0, 91], sizes = [4, 352], strides = [1, 1]} : vector<4x506xf32> to vector<4x352xf32>
    %10 = vector.extract_strided_slice %1 {offsets = [0, 92], sizes = [4, 352], strides = [1, 1]} : vector<4x506xf32> to vector<4x352xf32>
    %11 = tpu.concatenate %2, %3, %4, %5, %6, %7, %8, %9, %10 in 0 : vector<4x352xf32>, vector<4x352xf32>, vector<4x352xf32>, vector<4x352xf32>, vector<4x352xf32>, vector<4x352xf32>, vector<4x352xf32>, vector<4x352xf32>, vector<4x352xf32> -> vector<36x352xf32>
    %c0_2 = arith.constant 0 : index
    %c0_3 = arith.constant 0 : index
    %12 = vector.load %arg2[%c0_2, %c0_3] : memref<4x36xf32, #tpu.memory_space<vmem>>, vector<4x36xf32>
    %cst = arith.constant dense<0.000000e+00> : vector<4x352xf32>
    %13 = tpu.matmul %12, %11, %cst {dimension_numbers = #tpu.dot_dimension_numbers<[1], [0], [0], [1], [0, 0, 1, 1], [], []>} : vector<4x36xf32>, vector<36x352xf32>, vector<4x352xf32> -> vector<4x352xf32>
    %14 = vector.extract_strided_slice %13 {offsets = [0, 0], sizes = [4, 16], strides = [1, 1]} : vector<4x352xf32> to vector<4x16xf32>
    %15 = vector.extract_strided_slice %13 {offsets = [0, 22], sizes = [4, 16], strides = [1, 1]} : vector<4x352xf32> to vector<4x16xf32>
    %16 = vector.extract_strided_slice %13 {offsets = [0, 44], sizes = [4, 16], strides = [1, 1]} : vector<4x352xf32> to vector<4x16xf32>
    %17 = vector.extract_strided_slice %13 {offsets = [0, 66], sizes = [4, 16], strides = [1, 1]} : vector<4x352xf32> to vector<4x16xf32>
    %18 = vector.extract_strided_slice %13 {offsets = [0, 88], sizes = [4, 16], strides = [1, 1]} : vector<4x352xf32> to vector<4x16xf32>
    %19 = vector.extract_strided_slice %13 {offsets = [0, 110], sizes = [4, 16], strides = [1, 1]} : vector<4x352xf32> to vector<4x16xf32>
    %20 = vector.extract_strided_slice %13 {offsets = [0, 132], sizes = [4, 16], strides = [1, 1]} : vector<4x352xf32> to vector<4x16xf32>
    %21 = vector.extract_strided_slice %13 {offsets = [0, 154], sizes = [4, 16], strides = [1, 1]} : vector<4x352xf32> to vector<4x16xf32>
    %22 = vector.extract_strided_slice %13 {offsets = [0, 176], sizes = [4, 16], strides = [1, 1]} : vector<4x352xf32> to vector<4x16xf32>
    %23 = vector.extract_strided_slice %13 {offsets = [0, 198], sizes = [4, 16], strides = [1, 1]} : vector<4x352xf32> to vector<4x16xf32>
    %24 = vector.extract_strided_slice %13 {offsets = [0, 220], sizes = [4, 16], strides = [1, 1]} : vector<4x352xf32> to vector<4x16xf32>
    %25 = vector.extract_strided_slice %13 {offsets = [0, 242], sizes = [4, 16], strides = [1, 1]} : vector<4x352xf32> to vector<4x16xf32>
    %26 = vector.extract_strided_slice %13 {offsets = [0, 264], sizes = [4, 16], strides = [1, 1]} : vector<4x352xf32> to vector<4x16xf32>
    %27 = vector.extract_strided_slice %13 {offsets = [0, 286], sizes = [4, 16], strides = [1, 1]} : vector<4x352xf32> to vector<4x16xf32>
    %28 = vector.extract_strided_slice %13 {offsets = [0, 308], sizes = [4, 16], strides = [1, 1]} : vector<4x352xf32> to vector<4x16xf32>
    %29 = vector.extract_strided_slice %13 {offsets = [0, 330], sizes = [4, 16], strides = [1, 1]} : vector<4x352xf32> to vector<4x16xf32>
    %30 = tpu.concatenate %14, %15, %16, %17, %18, %19, %20, %21, %22, %23, %24, %25, %26, %27, %28, %29 in 1 : vector<4x16xf32>, vector<4x16xf32>, vector<4x16xf32>, vector<4x16xf32>, vector<4x16xf32>, vector<4x16xf32>, vector<4x16xf32>, vector<4x16xf32>, vector<4x16xf32>, vector<4x16xf32>, vector<4x16xf32>, vector<4x16xf32>, vector<4x16xf32>, vector<4x16xf32>, vector<4x16xf32>, vector<4x16xf32> -> vector<4x256xf32>
    %c0_4 = arith.constant 0 : index
    %c0_5 = arith.constant 0 : index
    %31 = vector.load %arg3[%c0_4, %c0_5] : memref<4x1xf32, #tpu.memory_space<vmem>>, vector<4x1xf32>
    %32 = vector.broadcast %31 : vector<4x1xf32> to vector<4x256xf32>
    %33 = arith.mulf %30, %32 : vector<4x256xf32>
    %c0_6 = arith.constant 0 : index
    %c0_7 = arith.constant 0 : index
    %34 = vector.load %arg4[%c0_6, %c0_7] : memref<4x1xf32, #tpu.memory_space<vmem>>, vector<4x1xf32>
    %35 = vector.broadcast %34 : vector<4x1xf32> to vector<4x256xf32>
    %36 = arith.addf %33, %35 : vector<4x256xf32>
    %cst_8 = arith.constant 0.000000e+00 : f32
    %37 = vector.broadcast %cst_8 : f32 to vector<4x256xf32>
    %38 = arith.cmpf oge, %36, %37 : vector<4x256xf32>
    %cst_9 = arith.constant 2.000000e-01 : f32
    %39 = vector.broadcast %cst_9 : f32 to vector<4x256xf32>
    %40 = arith.mulf %39, %36 : vector<4x256xf32>
    %41 = arith.select %38, %36, %40 : vector<4x256xi1>, vector<4x256xf32>
    %42 = vector.extract_strided_slice %1 {offsets = [0, 0], sizes = [4, 352], strides = [1, 1]} : vector<4x506xf32> to vector<4x352xf32>
    %43 = vector.extract_strided_slice %1 {offsets = [0, 3], sizes = [4, 352], strides = [1, 1]} : vector<4x506xf32> to vector<4x352xf32>
    %44 = vector.extract_strided_slice %1 {offsets = [0, 6], sizes = [4, 352], strides = [1, 1]} : vector<4x506xf32> to vector<4x352xf32>
    %45 = vector.extract_strided_slice %1 {offsets = [0, 66], sizes = [4, 352], strides = [1, 1]} : vector<4x506xf32> to vector<4x352xf32>
    %46 = vector.extract_strided_slice %1 {offsets = [0, 69], sizes = [4, 352], strides = [1, 1]} : vector<4x506xf32> to vector<4x352xf32>
    %47 = vector.extract_strided_slice %1 {offsets = [0, 72], sizes = [4, 352], strides = [1, 1]} : vector<4x506xf32> to vector<4x352xf32>
    %48 = vector.extract_strided_slice %1 {offsets = [0, 132], sizes = [4, 352], strides = [1, 1]} : vector<4x506xf32> to vector<4x352xf32>
    %49 = vector.extract_strided_slice %1 {offsets = [0, 135], sizes = [4, 352], strides = [1, 1]} : vector<4x506xf32> to vector<4x352xf32>
    %50 = vector.extract_strided_slice %1 {offsets = [0, 138], sizes = [4, 352], strides = [1, 1]} : vector<4x506xf32> to vector<4x352xf32>
    %51 = tpu.concatenate %42, %43, %44, %45, %46, %47, %48, %49, %50 in 0 : vector<4x352xf32>, vector<4x352xf32>, vector<4x352xf32>, vector<4x352xf32>, vector<4x352xf32>, vector<4x352xf32>, vector<4x352xf32>, vector<4x352xf32>, vector<4x352xf32> -> vector<36x352xf32>
    %c0_10 = arith.constant 0 : index
    %c0_11 = arith.constant 0 : index
    %52 = vector.load %arg5[%c0_10, %c0_11] : memref<4x36xf32, #tpu.memory_space<vmem>>, vector<4x36xf32>
    %cst_12 = arith.constant dense<0.000000e+00> : vector<4x352xf32>
    %53 = tpu.matmul %52, %51, %cst_12 {dimension_numbers = #tpu.dot_dimension_numbers<[1], [0], [0], [1], [0, 0, 1, 1], [], []>} : vector<4x36xf32>, vector<36x352xf32>, vector<4x352xf32> -> vector<4x352xf32>
    %54 = vector.extract_strided_slice %53 {offsets = [0, 0], sizes = [4, 16], strides = [1, 1]} : vector<4x352xf32> to vector<4x16xf32>
    %55 = vector.extract_strided_slice %53 {offsets = [0, 22], sizes = [4, 16], strides = [1, 1]} : vector<4x352xf32> to vector<4x16xf32>
    %56 = vector.extract_strided_slice %53 {offsets = [0, 44], sizes = [4, 16], strides = [1, 1]} : vector<4x352xf32> to vector<4x16xf32>
    %57 = vector.extract_strided_slice %53 {offsets = [0, 66], sizes = [4, 16], strides = [1, 1]} : vector<4x352xf32> to vector<4x16xf32>
    %58 = vector.extract_strided_slice %53 {offsets = [0, 88], sizes = [4, 16], strides = [1, 1]} : vector<4x352xf32> to vector<4x16xf32>
    %59 = vector.extract_strided_slice %53 {offsets = [0, 110], sizes = [4, 16], strides = [1, 1]} : vector<4x352xf32> to vector<4x16xf32>
    %60 = vector.extract_strided_slice %53 {offsets = [0, 132], sizes = [4, 16], strides = [1, 1]} : vector<4x352xf32> to vector<4x16xf32>
    %61 = vector.extract_strided_slice %53 {offsets = [0, 154], sizes = [4, 16], strides = [1, 1]} : vector<4x352xf32> to vector<4x16xf32>
    %62 = vector.extract_strided_slice %53 {offsets = [0, 176], sizes = [4, 16], strides = [1, 1]} : vector<4x352xf32> to vector<4x16xf32>
    %63 = vector.extract_strided_slice %53 {offsets = [0, 198], sizes = [4, 16], strides = [1, 1]} : vector<4x352xf32> to vector<4x16xf32>
    %64 = vector.extract_strided_slice %53 {offsets = [0, 220], sizes = [4, 16], strides = [1, 1]} : vector<4x352xf32> to vector<4x16xf32>
    %65 = vector.extract_strided_slice %53 {offsets = [0, 242], sizes = [4, 16], strides = [1, 1]} : vector<4x352xf32> to vector<4x16xf32>
    %66 = vector.extract_strided_slice %53 {offsets = [0, 264], sizes = [4, 16], strides = [1, 1]} : vector<4x352xf32> to vector<4x16xf32>
    %67 = vector.extract_strided_slice %53 {offsets = [0, 286], sizes = [4, 16], strides = [1, 1]} : vector<4x352xf32> to vector<4x16xf32>
    %68 = vector.extract_strided_slice %53 {offsets = [0, 308], sizes = [4, 16], strides = [1, 1]} : vector<4x352xf32> to vector<4x16xf32>
    %69 = vector.extract_strided_slice %53 {offsets = [0, 330], sizes = [4, 16], strides = [1, 1]} : vector<4x352xf32> to vector<4x16xf32>
    %70 = tpu.concatenate %54, %55, %56, %57, %58, %59, %60, %61, %62, %63, %64, %65, %66, %67, %68, %69 in 1 : vector<4x16xf32>, vector<4x16xf32>, vector<4x16xf32>, vector<4x16xf32>, vector<4x16xf32>, vector<4x16xf32>, vector<4x16xf32>, vector<4x16xf32>, vector<4x16xf32>, vector<4x16xf32>, vector<4x16xf32>, vector<4x16xf32>, vector<4x16xf32>, vector<4x16xf32>, vector<4x16xf32>, vector<4x16xf32> -> vector<4x256xf32>
    %c0_13 = arith.constant 0 : index
    %c0_14 = arith.constant 0 : index
    %71 = vector.load %arg6[%c0_13, %c0_14] : memref<4x1xf32, #tpu.memory_space<vmem>>, vector<4x1xf32>
    %72 = vector.broadcast %71 : vector<4x1xf32> to vector<4x256xf32>
    %73 = arith.mulf %70, %72 : vector<4x256xf32>
    %c0_15 = arith.constant 0 : index
    %c0_16 = arith.constant 0 : index
    %74 = vector.load %arg7[%c0_15, %c0_16] : memref<4x1xf32, #tpu.memory_space<vmem>>, vector<4x1xf32>
    %75 = vector.broadcast %74 : vector<4x1xf32> to vector<4x256xf32>
    %76 = arith.addf %73, %75 : vector<4x256xf32>
    %cst_17 = arith.constant 0.000000e+00 : f32
    %77 = vector.broadcast %cst_17 : f32 to vector<4x256xf32>
    %78 = arith.cmpf oge, %76, %77 : vector<4x256xf32>
    %cst_18 = arith.constant 2.000000e-01 : f32
    %79 = vector.broadcast %cst_18 : f32 to vector<4x256xf32>
    %80 = arith.mulf %79, %76 : vector<4x256xf32>
    %81 = arith.select %78, %76, %80 : vector<4x256xi1>, vector<4x256xf32>
    %82 = tpu.concatenate %41, %81 in 0 : vector<4x256xf32>, vector<4x256xf32> -> vector<8x256xf32>
    %c0_19 = arith.constant 0 : index
    %c0_20 = arith.constant 0 : index
    %c0_21 = arith.constant 0 : index
    %83 = vector.load %arg8[%c0_19, %c0_20, %c0_21] : memref<1x8x256xf32, #tpu.memory_space<vmem>>, vector<1x8x256xf32>
    %84 = vector.shape_cast %83 : vector<1x8x256xf32> to vector<8x256xf32>
    %85 = vector.shape_cast %82 : vector<8x256xf32> to vector<1x8x256xf32>
    tpu.vector_store %arg8[%c0_19, %c0_20, %c0_21], %85 {strides = array<i32>} : memref<1x8x256xf32, #tpu.memory_space<vmem>>, vector<1x8x256xf32>,
    return
  }
  func.func @transform_0(%arg0: i32) -> (i32, i32, i32) {
    %c0_i32 = arith.constant 0 : i32
    %c0_i32_0 = arith.constant 0 : i32
    %c0_i32_1 = arith.constant 0 : i32
    return %arg0, %c0_i32, %c0_i32_0 : i32, i32, i32
  }
  func.func @transform_1(%arg0: i32) -> (i32, i32) {
    %c0_i32 = arith.constant 0 : i32
    %c0_i32_0 = arith.constant 0 : i32
    %c0_i32_1 = arith.constant 0 : i32
    return %c0_i32, %c0_i32_0 : i32, i32
  }
  func.func @transform_2(%arg0: i32) -> (i32, i32) {
    %c0_i32 = arith.constant 0 : i32
    %c0_i32_0 = arith.constant 0 : i32
    %c0_i32_1 = arith.constant 0 : i32
    return %c0_i32, %c0_i32_0 : i32, i32
  }
  func.func @transform_3(%arg0: i32) -> (i32, i32) {
    %c0_i32 = arith.constant 0 : i32
    %c0_i32_0 = arith.constant 0 : i32
    %c0_i32_1 = arith.constant 0 : i32
    return %c0_i32, %c0_i32_0 : i32, i32
  }
  func.func @transform_4(%arg0: i32) -> (i32, i32) {
    %c0_i32 = arith.constant 0 : i32
    %c0_i32_0 = arith.constant 0 : i32
    %c0_i32_1 = arith.constant 0 : i32
    return %c0_i32, %c0_i32_0 : i32, i32
  }
  func.func @transform_5(%arg0: i32) -> (i32, i32) {
    %c0_i32 = arith.constant 0 : i32
    %c0_i32_0 = arith.constant 0 : i32
    %c0_i32_1 = arith.constant 0 : i32
    return %c0_i32, %c0_i32_0 : i32, i32
  }
  func.func @transform_6(%arg0: i32) -> (i32, i32) {
    %c0_i32 = arith.constant 0 : i32
    %c0_i32_0 = arith.constant 0 : i32
    %c0_i32_1 = arith.constant 0 : i32
    return %c0_i32, %c0_i32_0 : i32, i32
  }
  func.func @transform_7(%arg0: i32) -> (i32, i32, i32) {
    %c0_i32 = arith.constant 0 : i32
    %c0_i32_0 = arith.constant 0 : i32
    %c0_i32_1 = arith.constant 0 : i32
    return %arg0, %c0_i32, %c0_i32_0 : i32, i32, i32
  }
}

</mosaic_0001>

<bundles_post_ra>
// kernel: tpu_custom_call.1
= control target key start
LH: loop header
LB: loop body
LE: loop exit
PB: predicated region body
PF: predicated region fallthrough
CT: control target
= control target key end

     0   :  { %12 = vsyncpa [#allocation3], 0  ;;  %s2309_s0 = inlined_call_operand.hbm [shape: f32[2,4,506], index: 0, kind: input, shape index: {}]   ;;  %s2310_s1 = inlined_call_operand.vmem [shape: f32[4,36], index: 1, kind: input, shape index: {}]   ;;  %s2311_s2 = inlined_call_operand.vmem [shape: f32[4,1], index: 2, kind: input, shape index: {}]   ;;  %s2312_s3 = inlined_call_operand.vmem [shape: f32[4,1], index: 3, kind: input, shape index: {}]   ;;  %s2313_s4 = inlined_call_operand.vmem [shape: f32[4,36], index: 4, kind: input, shape index: {}]   ;;  %s2314_s5 = inlined_call_operand.vmem [shape: f32[4,1], index: 5, kind: input, shape index: {}]   ;;  %s2315_s6 = inlined_call_operand.vmem [shape: f32[4,1], index: 6, kind: input, shape index: {}]   ;;  %s2316_s7 = inlined_call_operand.hbm [shape: f32[2,8,256], index: 7, kind: output, shape index: {}]  }
   0x1   :  { %14 = vsyncpa [#allocation3 + $0x1], 0 }
   0x2   :  { %15 = vsyncpa [#allocation4], 0 }
   0x3   :  { %17 = vsyncpa [#allocation4 + $0x1], 0  ;;  %s1728_s24 = smov 0   ;;  %s1730_s25 = smov 0  }
   0x4   :  { %s1732_s26 = smov 0   ;;  %s1734_s27 = smov 0  }
   0x5 LB: > { %s1749_s28 = sadd.s32 4294967295, %s1653_s27   ;;  %s1222_s29 = sadd.s32 4294967294, %s1653_s27   ;;  %s1653_s27 = sphi %s1734_s27, %s2335_s27   ;;  %s1649_s26 = sphi %s1732_s26, %s2334_s26   ;;  %s1645_s25 = sphi %s1730_s25, %s2333_s25   ;;  %s1641_s24 = sphi %s1728_s24, %s2332_s24  }
   0x6   : > { %s1753_s30 = sadd.s32 1, %s1653_s27   ;;  %s30_s8 = sadd.s32 1, %s1649_s26 }
   0x7   : > { %s27_s9 = ssub.s32 %s1653_s27, %s1753_s30  ;;  %p37_p0 = scmp.ne.s32.totalorder %s1649_s26, %s1645_s25 }
   0x8   : > { %p28_p1 = scmp.eq.s32.totalorder %s27_s9, 0  ;;  %p38_p2 = scmp.eq.s32.totalorder %s1653_s27, 0 }
   0x9   : > { %p43_p3 = scmp.ne.s32.totalorder %s1645_s25, %s1641_s24  ;;  %p44_p4 = scmp.eq.s32.totalorder %s1749_s28, 0 }
   0xa   : > { %s1765_s10 = scalar_select %p28_p1, %s1649_s26, %s30_s8  }
   0xb   : > { %p1767_p5 = por %p38_p2, %p37_p0  ;;  %p1771_p6 = por %p44_p4, %p43_p3 }
   0xc   : > { %p193_p7 = scmp.eq.s32.totalorder %s1749_s28, 1  ;;  %p199_p8 = scmp.eq.s32.totalorder %s1222_s29, 1 }
   0xd   : > { %p1326_p10 = scmp.lt.s32.totalorder %s1653_s27, 2  ;;  %s237_s15 = sand.u32 1, %s1649_s26  }
   0xe   : > { %p1778_p11 = por %p193_p7, %p37_p0  ;;  %p1782_p12 = por %p199_p8, %p43_p3 }
   0xf   : > { %s1246_s16 = sshll.u32 %s1653_s27, 8  ;;  %s1225_s17 = sshll.u32 %s237_s15, 4 }
  0x10   : > { %s2322_s13 = scalar_select %p1778_p11, 1, 0 }
  0x11   : > { %s2323_s14 = scalar_select %p1782_p12, 1, 0 }
  0x12   : > { %s1791_s20 = scalar_lea.hbm %s2309_s0, %s1246_s16  ;;  %s241_s21 = scalar_lea.vmem [#allocation2], %s1225_s17 }
  0x13   : > { %s249_s22 = sshll.u32 %s241_s21, 4  ;;  %p1795_p13 = pnand %p1326_p10, %p1767_p5  ;;  %s1799_s22 = int_to_ptr.vmem [resolvable:$true] %s249_s22 }
  0x14   : > { %s238_s29 = scalar_lea.sflag [#allocation3], %s237_s15  ;;  %s1557_s8 = scalar_lea.hbm %s1791_s20, 256 }
  0x15   : > { %p1558_p2 = scmp.ne.s32.totalorder %s1791_s20, %s1557_s8  ;;  %p1559_p3 = pneg %p1795_p13 }
  0x16   : > { %s1562_s16 = scalar_lea.hbm %s2309_s0, 512  ;;  %p1563_p5 = scmp.lt.u32.totalorder %s1791_s20, %s2309_s0 }
  0x17   : > { %p1560_p4 = pnand %p1559_p3, %p1558_p2  ;;  %p1564_p8 = scmp.lt.u32.totalorder %s1562_s16, %s1557_s8 }
  0x18   : > { %p1566_p9 = scmp.lt.u32.totalorder %s1557_s8, %s1791_s20 }
  0x19   : > { %p1561_p7 = pneg %p1560_p4  ;;  %p1565_p10 = por %p1564_p8, %p1563_p5 }
  0x1b   : > { %p1567_p0 = por %p1566_p9, %p1565_p10 }
  0x1d   : > { %p1568_p1 = pnand %p1567_p0, %p1561_p7 }
  0x1f   : > { %1571 = shalt.err (!%p1568_p1)
}
  0x20   : > { %s1572_s15 = scalar_lea.vmem %s1799_s22, 256  ;;  %s1655_s19 = smov [#allocation2]  }
  0x21   : > { %p1573_p2 = scmp.ne.s32.totalorder %s1799_s22, %s1572_s15  ;;  %s1577_s21 = sshll.u32 %s1655_s19, 4  ;;  %s1578_s21 = int_to_ptr.vmem [resolvable:$false] %s1577_s21 }
  0x22   : > { %s1579_s9 = scalar_lea.vmem %s1578_s21, 512  ;;  %p1580_p11 = scmp.lt.s32.totalorder %s1799_s22, %s1578_s21 }
  0x23   : > { %p1575_p4 = pnand %p1573_p2, %p1559_p3  ;;  %p1581_p5 = scmp.lt.s32.totalorder %s1579_s9, %s1572_s15 }
  0x25   : > { %p1576_p12 = pneg %p1575_p4  ;;  %p1582_p8 = por %p1581_p5, %p1580_p11 }
  0x27   : > { %p1583_p9 = pnand %p1582_p8, %p1576_p12 }
  0x29   : > { %1586 = shalt.err (!%p1583_p9)
}
  0x2a   : > { %1321 = dma.hbm_to_vmem [thread:$0]  (!%p1795_p13), %s1791_s20, 256, %s1799_s22, %s238_s29  }
  0x2b   : > { %p2325_p0 = scmp.lt.s32.totalorder %s1653_s27, 3  ;;  %p2326_p1 = scmp.ge.s32.totalorder %s1653_s27, 1 }
  0x2d   : > { %p255_p3 = pnand %p2326_p1, %p2325_p0 }
  0x2e   : > { %s1833_s8 = sand.u32 (!%p255_p3), 1, %s1645_s25  }
  0x2f   : > { %258 = sbr.rel (%p255_p3) target bundleno = 770 (0x302), region = 48  ;;  %s2318_s11 = sshll.u32 (!%p255_p3), %s1833_s8, 4 }
  0x30   : > { %s261_s16 = scalar_lea.sflag (!%p255_p3), [#allocation3], %s1833_s8  ;;  %s264_s23 = scalar_lea.vmem (!%p255_p3), [#allocation2], %s2318_s11 }
  0x36   : > { %1632 = dma.done.wait (%p1771_p6), %s261_s16, 256  }
  0x37   : > { %1634 = vsyncadd (%p1771_p6), %s261_s16, 4294967040  ;;  %v1843_v0 = vld [vmem:[%s264_s23] sm:$0xff]  ;;  %v1845_v1 = vld [vmem:[%s264_s23 + $0x8] sm:$0xff]  ;;  %s1656_s12 = smov 127   ;;  %s1657_s20 = smov 126   ;;  %vm313_vm0 = vcmask 1039360  }
  0x38   : > { %v1849_v2 = vcombine.low %v1845_v1, %v1845_v1  ;;  %v1853_v3 = vcombine.high %v1843_v0, %v1843_v0  ;;  %v303_v4 = vcombine.low %v1843_v0, %v1843_v0  ;;  %v1859_v5 = vcombine.high %v1845_v1, %v1845_v1  ;;  %s1658_s22 = smov 106   ;;  %s1659_s29 = smov 105  }
  0x39   : > { %s1660_s17 = smov 104   ;;  %s1661_s18 = smov 84   ;;  %vm329_vm1 = vcmask 1031168   ;;  %vm429_vm2 = vcmask 1043456   ;;  %vm345_vm3 = vcmask 867328   ;;  %vm425_vm4 = vcmask 670720  }
  0x3a   : > { %v1391_v6 = vpack.i.bf16 %v1849_v2, %v1843_v0  ;;  %v1401_v7 = vpack.i.bf16 %v1845_v1, %v1853_v3  ;;  %v1396_v8 = vpack.i.bf16 %v303_v4, %v1845_v1  ;;  %v1406_v9 = vpack.i.bf16 %v1843_v0, %v1859_v5  ;;  %s1662_s15 = smov 83   ;;  %s1663_s19 = smov 82  }
  0x3b   : > { %s1664_s21 = smov 122   ;;  %s1665_s9 = smov 125   ;;  %v1881_v10 = vpack.i.bf16 %v1845_v1, %v303_v4  ;;  %v1491_v11 = vpack.i.bf16 %v1859_v5, %v1845_v1  ;;  %vm361_vm5 = vcmask 859136   ;;  %vm377_vm6 = vcmask 850944  }
  0x3c   : > { %1392 = vrot.lane.b32.xlu0 %v1391_v6, %s1656_s12  ;;  %1402 = vrot.lane.b32.xlu1 %v1401_v7, %s1657_s20  ;;  %s1666_s16 = smov 62   ;;  %s1667_s23 = smov 59   ;;  %vm409_vm7 = vcmask 678912   ;;  %vm393_vm8 = vcmask 687104   ;;  %vm1672_vm9 = vmmov 0   ;;  %vm782_vm10 = vcmask 1022976  }
  0x3d   : > { %vm794_vm11 = vcmask 998400   ;;  %vm718_vm12 = vcmask 506880   ;;  %vm822_vm13 = vcmask 482304   ;;  %vm837_vm14 = vcmask 457728   ;;  %s1681_s11 = smov 80   ;;  %p2329_p11 = scmp.ne.s32.totalorder %s2322_s13, 0 }
  0x3e   : > { %vm862_vm15 = vcmask 990208  }
  0x40   : > { %1397 = vrot.lane.b32.xlu0 %v1396_v8, %s1656_s12  ;;  %1407 = vrot.lane.b32.xlu1 %v1406_v9, %s1657_s20  ;;  %s1668_s12 = smov 56   ;;  %s1669_s20 = smov 124  }
  0x44   : > { %1412 = vrot.lane.b32.xlu0 %v1391_v6, %s1658_s22  ;;  %1417 = vrot.lane.b32.xlu1 %v1396_v8, %s1658_s22  ;;  %s1673_s22 = smov 121  }
  0x48   : > { %1422 = vrot.lane.b32.xlu0 %v1401_v7, %s1659_s29  ;;  %1427 = vrot.lane.b32.xlu1 %v1406_v9, %s1659_s29  ;;  %s1675_s29 = smov 118  }
  0x4c   : > { %1432 = vrot.lane.b32.xlu0 %v1391_v6, %s1660_s17  ;;  %1437 = vrot.lane.b32.xlu1 %v1396_v8, %s1660_s17 }
  0x50   : > { %1442 = vrot.lane.b32.xlu0 %v1401_v7, %s1661_s18  ;;  %1447 = vrot.lane.b32.xlu1 %v1406_v9, %s1661_s18  ;;  %s1683_s18 = smov 92  }
  0x54   : > { %1452 = vrot.lane.b32.xlu0 %v1391_v6, %s1662_s15  ;;  %1457 = vrot.lane.b32.xlu1 %v1396_v8, %s1662_s15  ;;  %s1684_s15 = smov 44  }
  0x58   : > { %419 = vrot.lane.b32.xlu0 %v1853_v3, %s1663_s19  ;;  %421 = vrot.lane.b32.xlu1 %v1845_v1, %s1663_s19 }
  0x5c   : > { %423 = vrot.lane.b32.xlu0 %v1859_v5, %s1663_s19  ;;  %417 = vrot.lane.b32.xlu1 %v1843_v0, %s1663_s19 }
  0x60   : > { %1467 = vrot.lane.b32.xlu1 %v1401_v7, %s1664_s21  ;;  %1462 = vrot.lane.b32.xlu0 %v1391_v6, %s1665_s9 }
  0x64   : > { %776 = vrot.lane.b32.xlu1 %v303_v4, %s1665_s9  ;;  %1472 = vrot.lane.b32.xlu0 %v1391_v6, %s1666_s16  ;;  %s2319_s9 = smov 110  }
  0x68   : > { %1477 = vrot.lane.b32.xlu1 %v1881_v10, %s1666_s16  ;;  %788 = vrot.lane.b32.xlu0 %v1843_v0, %s1664_s21 }
  0x6c   : > { %1482 = vrot.lane.b32.xlu0 %v1401_v7, %s1667_s23  ;;  %1487 = vrot.lane.b32.xlu1 %v1391_v6, %s1668_s12 }
  0x70   : > { %1492 = vrot.lane.b32.xlu0 %v1491_v11, %s1669_s20 }
  0xae   : > { %v1393_v12 = vpop.permute.xlu0 %1392  ;;  %v1892_v13 = vpop.permute.xlu1 %1402 }
  0xaf   : > { %v1395_v31 = vunpack.i.h.bf16 %v1393_v12  ;;  %v1394_v32 = vunpack.i.l.bf16 %v1393_v12  ;;  %v1405_v33 = vunpack.i.h.bf16 %v1892_v13  ;;  %v1404_v34 = vunpack.i.l.bf16 %v1892_v13 }
  0xb1   : > { %v315_v45 = vsel %vm313_vm0, %v1394_v32, %v1395_v31  ;;  %v331_v46 = vsel %vm329_vm1, %v1404_v34, %v1405_v33 }
  0xb2   : > { %v1398_v14 = vpop.permute.xlu0 %1397  ;;  %v1894_v15 = vpop.permute.xlu1 %1407  ;;  %v431_v6 = vsel %vm429_vm2, %v1853_v3, %v315_v45  ;;  %v1671_v45 = vmov 0.0  }
  0xb3   : > { %v1399_v26 = vunpack.i.l.bf16 %v1398_v14  ;;  %v1409_v27 = vunpack.i.l.bf16 %v1894_v15  ;;  %v1400_v35 = vunpack.i.h.bf16 %v1398_v14  ;;  %v1410_v37 = vunpack.i.h.bf16 %v1894_v15  ;;  %604 = vmatprep.mubr.f32.mxu0 %v1671_v45  ;;  %1270 = vmatprep.mubr.msk.f32.mxu1 %vm1672_vm9, %v1671_v45 }
  0xb5   : > { %v316_v36 = vsel %vm313_vm0, %v1395_v31, %v1399_v26  ;;  %v433_v49 = vsel %vm429_vm2, %v1859_v5, %v1399_v26  ;;  %v314_v50 = vsel %vm313_vm0, %v1400_v35, %v1394_v32  ;;  %v330_v51 = vsel %vm329_vm1, %v1410_v37, %v1404_v34 }
  0xb6   : > { %v1896_v16 = vpop.permute.xlu0 %1412  ;;  %v1898_v17 = vpop.permute.xlu1 %1417  ;;  %v432_v53 = vsel %vm429_vm2, %v1845_v1, %v316_v36  ;;  %v332_v7 = vsel %vm329_vm1, %v1405_v33, %v1409_v27  ;;  %v430_v13 = vsel %vm429_vm2, %v1843_v0, %v314_v50  ;;  %v1531_v50 = vpack.i.bf16 %v1845_v1, %v1849_v2  ;;  %v762_v2 = vld [vmem:[%s2312_s3] sm:$0xf] }
  0xb7   : > { %v1419_v28 = vunpack.i.l.bf16 %v1898_v17  ;;  %v1414_v38 = vunpack.i.l.bf16 %v1896_v16  ;;  %v1420_v39 = vunpack.i.h.bf16 %v1898_v17  ;;  %v1415_v43 = vunpack.i.h.bf16 %v1896_v16 }
  0xb8   : > { %v1506_v12 = vpack.i.bf16 %v432_v53, %v431_v6  ;;  %v754_v53 = vld [vmem:[%s2311_s2] sm:$0xf]  ;;  %vm850_vm0 = vcmask 1014784   ;;  %vm530_vm1 = vcmask 293888  }
  0xb9   : > { %v437_v42 = vsel %vm429_vm2, %v1409_v27, %v1419_v28  ;;  %v346_v54 = vsel %vm345_vm3, %v1420_v39, %v1414_v38  ;;  %v347_v58 = vsel %vm345_vm3, %v1414_v38, %v1415_v43  ;;  %v348_v8 = vsel %vm345_vm3, %v1415_v43, %v1419_v28 }
  0xba   : > { %v1900_v18 = vpop.permute.xlu0 %1422  ;;  %v1902_v19 = vpop.permute.xlu1 %1427  ;;  %v1496_v52 = vpack.i.bf16 %v437_v42, %v433_v49  ;;  %v434_v11 = vsel %vm429_vm2, %v330_v51, %v346_v54  ;;  %v435_v14 = vsel %vm429_vm2, %v331_v46, %v347_v58  ;;  %v436_v31 = vsel %vm429_vm2, %v332_v7, %v348_v8 }
  0xbb   : > { %v1429_v55 = vunpack.i.l.bf16 %v1902_v19  ;;  %v1425_v62 = vunpack.i.h.bf16 %v1900_v18  ;;  %v1424_v63 = vunpack.i.l.bf16 %v1900_v18  ;;  %v1516_v28 = vpack.i.bf16 %v434_v11, %v430_v13 }
  0xbc   : > { %v1541_v51 = vpack.i.bf16 %v1859_v5, %v1843_v0  ;;  %vm874_vm3 = vcmask 965632  }
  0xbd   : > { %v363_v26 = vsel %vm361_vm5, %v1424_v63, %v1425_v62  ;;  %v364_v32 = vsel %vm361_vm5, %v1425_v62, %v1429_v55 }
  0xbe   : > { %v1904_v20 = vpop.permute.xlu0 %1432  ;;  %v1906_v21 = vpop.permute.xlu1 %1437 }
  0xbf   : > { %v1439_v56 = vunpack.i.l.bf16 %v1906_v21  ;;  %v1435_v59 = vunpack.i.h.bf16 %v1904_v20  ;;  %v1434_v60 = vunpack.i.l.bf16 %v1904_v20  ;;  %v1670_v20 = vmov 0.0|0.0  }
  0xc0   : > { %1294 = vmatprep.subr.bf16.mxu1 %v1670_v20  ;;  %v1440_v33 = vunpack.i.h.bf16 %v1906_v21 }
  0xc1   : > { %v441_v4 = vsel %vm429_vm2, %v1429_v55, %v1439_v56  ;;  %v379_v15 = vsel %vm377_vm6, %v1434_v60, %v1435_v59  ;;  %v380_v16 = vsel %vm377_vm6, %v1435_v59, %v1439_v56 }
  0xc2   : > { %v1908_v22 = vpop.permute.xlu0 %1442  ;;  %v1910_v23 = vpop.permute.xlu1 %1447  ;;  %v439_v37 = vsel %vm429_vm2, %v363_v26, %v379_v15  ;;  %v440_v38 = vsel %vm429_vm2, %v364_v32, %v380_v16 }
  0xc3   : > { %v1449_v47 = vunpack.i.l.bf16 %v1910_v23  ;;  %v1444_v34 = vunpack.i.l.bf16 %v1908_v22  ;;  %v1450_v35 = vunpack.i.h.bf16 %v1910_v23  ;;  %v1521_v43 = vpack.i.bf16 %v440_v38, %v439_v37 }
  0xc6   : > { %v1912_v24 = vpop.permute.xlu0 %1452  ;;  %v1914_v25 = vpop.permute.xlu1 %1457 }
  0xc7   : > { %v1459_v40 = vunpack.i.l.bf16 %v1914_v25  ;;  %v1455_v17 = vunpack.i.h.bf16 %v1912_v24  ;;  %v1454_v18 = vunpack.i.l.bf16 %v1912_v24  ;;  %v1460_v27 = vunpack.i.h.bf16 %v1914_v25 }
  0xc8   : > { %v1445_v24 = vunpack.i.h.bf16 %v1908_v22  ;;  %v1430_v22 = vunpack.i.h.bf16 %v1902_v19  ;;  %v394_v25 = vsel %vm393_vm8, %v1450_v35, %v1444_v34 }
  0xc9   : > { %v445_v57 = vsel %vm429_vm2, %v1449_v47, %v1459_v40  ;;  %v411_v39 = vsel %vm409_vm7, %v1454_v18, %v1455_v17  ;;  %v412_v21 = vsel %vm409_vm7, %v1455_v17, %v1459_v40  ;;  %v410_v23 = vsel %vm409_vm7, %v1460_v27, %v1454_v18 }
  0xca   : > { %v1918_v29 = vpop.permute.xlu0 %419  ;;  %v1920_v30 = vpop.permute.xlu1 %421  ;;  %v1501_v9 = vpack.i.bf16 %v445_v57, %v441_v4  ;;  %v396_v42 = vsel %vm393_vm8, %v1445_v24, %v1449_v47  ;;  %v442_v19 = vsel %vm429_vm2, %v394_v25, %v410_v23  ;;  %v362_v46 = vsel %vm361_vm5, %v1430_v22, %v1424_v63 }
  0xcb   : > { %v427_v36 = vsel %vm425_vm4, %v1918_v29, %v1920_v30  ;;  %vm735_vm5 = vcmask 261120   ;;  %vm739_vm7 = vcmask 523264  }
  0xce   : > { %v424_v41 = vpop.permute.xlu0 %423  ;;  %v418_v48 = vpop.permute.xlu1 %417 }
  0xcf   : > { %501 = vrot.lane.b32.xlu1 %v424_v41, %s1663_s19  ;;  %v428_v44 = vsel %vm425_vm4, %v1920_v30, %v424_v41  ;;  %v426_v61 = vsel %vm425_vm4, %v418_v48, %v1918_v29  ;;  %v1511_v41 = vpack.i.bf16 %v436_v31, %v435_v14  ;;  %v378_v29 = vsel %vm377_vm6, %v1440_v33, %v1434_v60 }
  0xd0   : > { %499 = vrot.lane.b32.xlu0 %v428_v44, %s1663_s19  ;;  %v395_v30 = vsel %vm393_vm8, %v1444_v34, %v1445_v24  ;;  %v444_v44 = vsel %vm429_vm2, %v396_v42, %v412_v21  ;;  %v438_v47 = vsel %vm429_vm2, %v362_v46, %v378_v29  ;;  %vm737_vm6 = vcmask 392192  }
  0xd1   : > { %v443_v40 = vsel %vm429_vm2, %v395_v30, %v411_v39  ;;  %v1536_v49 = vpack.i.bf16 %v442_v19, %v438_v47  ;;  %vm741_vm8 = vcmask 654336  }
  0xd2   : > { %v1526_v48 = vpack.i.bf16 %v444_v44, %v443_v40  ;;  %v1463_v54 = vpop.permute.xlu0 %1462  ;;  %v2037_v55 = vpop.permute.xlu1 %1467 }
  0xd3   : > { %1497 = vrot.lane.b32.xlu1 %v1496_v52, %s1663_s19  ;;  %v1674_v52 = vmov 0   ;;  %v1470_v8 = vunpack.i.h.bf16 %v2037_v55  ;;  %v1465_v11 = vunpack.i.h.bf16 %v1463_v54 }
  0xd4   : > { %495 = vrot.lane.b32.xlu0 %v426_v61, %s1663_s19  ;;  %1552 = vset.pattern.permute.xlu1 %v1674_v52 }
  0xd5   : > { %1551 = vset.pattern.permute.xlu0 %v1674_v52  ;;  %v2063_v33 = vsel %vm429_vm2, %v1845_v1, %v1465_v11 }
  0xd6   : > { %v1473_v56 = vpop.permute.xlu0 %1472  ;;  %v777_v57 = vpop.permute.xlu1 %776 }
  0xd7   : > { %1502 = vrot.lane.b32.xlu1 %v1501_v9, %s1663_s19  ;;  %v1469_v9 = vunpack.i.l.bf16 %v2037_v55  ;;  %v1475_v13 = vunpack.i.h.bf16 %v1473_v56  ;;  %v1474_v14 = vunpack.i.l.bf16 %v1473_v56 }
  0xd8   : > { %1507 = vrot.lane.b32.xlu0 %v1506_v12, %s1663_s19  ;;  %v1464_v12 = vunpack.i.l.bf16 %v1463_v54 }
  0xd9   : > { %v796_v18 = vsel %vm794_vm11, %v1469_v9, %v1470_v8  ;;  %v809_v27 = vsel %vm718_vm12, %v1474_v14, %v1475_v13 }
  0xda   : > { %v789_v58 = vpop.permute.xlu0 %788  ;;  %v1478_v60 = vpop.permute.xlu1 %1477  ;;  %v784_v17 = vsel %vm782_vm10, %v1464_v12, %v1465_v11  ;;  %v783_v26 = vsel %vm782_vm10, %v777_v57, %v1464_v12  ;;  %v2074_v38 = vsel %vm429_vm2, %v796_v18, %v809_v27  ;;  %vm745_vm10 = vcmask 916480  }
  0xdb   : > { %497 = vrot.lane.b32.xlu1 %v427_v36, %s1663_s19  ;;  %v1479_v31 = vunpack.i.l.bf16 %v1478_v60  ;;  %v2067_v34 = vsel %vm429_vm2, %v1853_v3, %v784_v17  ;;  %v2071_v35 = vsel %vm429_vm2, %v1843_v0, %v783_v26 }
  0xdc   : > { %1517 = vrot.lane.b32.xlu0 %v1516_v28, %s1663_s19  ;;  %v1480_v28 = vunpack.i.h.bf16 %v1478_v60 }
  0xdd   : > { %v808_v21 = vsel %vm718_vm12, %v1479_v31, %v1474_v14 }
  0xde   : > { %v2039_v59 = vpop.permute.xlu0 %1482  ;;  %v2041_v61 = vpop.permute.xlu1 %1487  ;;  %v2077_v39 = vsel %vm718_vm12, %v1475_v13, %v1480_v28 }
  0xdf   : > { %1512 = vrot.lane.b32.xlu1 %v1511_v41, %s1663_s19  ;;  %v1484_v23 = vunpack.i.l.bf16 %v2039_v59  ;;  %v1489_v52 = vunpack.i.l.bf16 %v2041_v61 }
  0xe0   : > { %1522 = vrot.lane.b32.xlu0 %v1521_v43, %s1663_s19 }
  0xe2   : > { %v2043_v62 = vpop.permute.xlu0 %1492 }
  0xe3   : > { %1527 = vrot.lane.b32.xlu1 %v1526_v48, %s1663_s19  ;;  %v1494_v13 = vunpack.i.l.bf16 %v2043_v62 }
  0xe4   : > { %1537 = vrot.lane.b32.xlu0 %v1536_v49, %s1663_s19  ;;  %s1676_s19 = smov 116  }
  0xe7   : > { %1532 = vrot.lane.b32.xlu1 %v1531_v50, %s1673_s22 }
  0xe8   : > { %1542 = vrot.lane.b32.xlu0 %v1541_v51, %s1667_s23  ;;  %s1678_s23 = smov 50  }
  0xeb   : > { %1547 = vrot.lane.b32.xlu1 %v1881_v10, %s1668_s12  ;;  %v1105_v10 = vld [vmem:[%s2314_s5] sm:$0xf] }
  0xec   : > { %844 = vrot.lane.b32.xlu0 %v1853_v3, %s1669_s20  ;;  %s1679_s20 = smov 98  }
  0xef   : > { %856 = vrot.lane.b32.xlu1 %v1843_v0, %s1673_s22  ;;  %v1490_v0 = vunpack.i.h.bf16 %v2041_v61  ;;  %s1680_s22 = smov 74  }
  0xf0   : > { %870 = vrot.lane.b32.xlu0 %v1845_v1, %s1675_s29  ;;  %v795_v1 = vsel %vm794_vm11, %v789_v58, %v1469_v9 }
  0xf1   : > { %v880_v31 = vsel %vm429_vm2, %v795_v1, %v808_v21  ;;  %v882_v1 = vsel %vm429_vm2, %v1470_v8, %v2077_v39  ;;  %v839_v21 = vsel %vm837_vm14, %v1489_v52, %v1490_v0 }
  0xf2   : > { %v1302_v55 = vpack.c.bf16 %v880_v31, %v2071_v35 }
  0xf3   : > { %872 = vrot.lane.b32.xlu1 %v1859_v5, %s1675_s29  ;;  %v1113_v5 = vld [vmem:[%s2315_s6] sm:$0xf] }
  0xf4   : > { %868 = vrot.lane.b32.xlu0 %v1853_v3, %s1675_s29  ;;  %v1485_v3 = vunpack.i.h.bf16 %v2039_v59  ;;  %s1682_s29 = smov 68  }
  0xf7   : > { %765 = vperm.xlu1 %1552, %v762_v2  }
  0xf8   : > { %1108 = vperm.xlu0 %1551, %v1105_v10  }
  0xfc   : > { %757 = vperm.xlu0 %1551, %v754_v53  }
 0x100   : > { %1116 = vperm.xlu0 %1551, %v1113_v5  }
 0x141   : > { %v2045_v63 = vpop.permute.xlu1 %501 }
 0x142   : > { %v2047_v4 = vpop.permute.xlu0 %499 }
 0x145   : > { %v1498_v6 = vpop.permute.xlu1 %1497 }
 0x146   : > { %v2049_v7 = vpop.permute.xlu0 %495  ;;  %v1499_v41 = vunpack.i.l.bf16 %v1498_v6  ;;  %v1500_v30 = vunpack.i.h.bf16 %v1498_v6  ;;  %v1495_v6 = vunpack.i.h.bf16 %v2043_v62 }
 0x148   : > { %v852_v39 = vsel %vm850_vm0, %v1494_v13, %v1495_v6 }
 0x149   : > { %v2053_v15 = vpop.permute.xlu1 %1502 }
 0x14a   : > { %v1508_v16 = vpop.permute.xlu0 %1507  ;;  %v1505_v54 = vunpack.i.h.bf16 %v2053_v15  ;;  %v1504_v56 = vunpack.i.l.bf16 %v2053_v15 }
 0x14b   : > { %v1510_v36 = vunpack.i.h.bf16 %v1508_v16  ;;  %v1509_v37 = vunpack.i.l.bf16 %v1508_v16 }
 0x14d   : > { %v2059_v32 = vpop.permute.xlu1 %497  ;;  %v504_v46 = vsel %vm425_vm4, %v1509_v37, %v1510_v36  ;;  %v505_v48 = vsel %vm425_vm4, %v1510_v36, %v1499_v41  ;;  %v1300_v41 = vpack.c.bf16 %v2074_v38, %v2067_v34 }
 0x14e   : > { %v1518_v24 = vpop.permute.xlu0 %1517 }
 0x14f   : > { %v1519_v22 = vunpack.i.l.bf16 %v1518_v24  ;;  %v1520_v42 = vunpack.i.h.bf16 %v1518_v24 }
 0x151   : > { %v1513_v29 = vpop.permute.xlu1 %1512  ;;  %v503_v50 = vsel %vm425_vm4, %v1519_v22, %v1509_v37  ;;  %v824_v22 = vsel %vm822_vm13, %v1484_v23, %v1485_v3 }
 0x152   : > { %v1515_v43 = vunpack.i.h.bf16 %v1513_v29  ;;  %v1514_v25 = vunpack.i.l.bf16 %v1513_v29  ;;  %v1523_v40 = vpop.permute.xlu0 %1522  ;;  %v516_v29 = vsel %vm425_vm4, %v2059_v32, %v2047_v4 }
 0x153   : > { %v1525_v44 = vunpack.i.h.bf16 %v1523_v40  ;;  %v1524_v19 = vunpack.i.l.bf16 %v1523_v40 }
 0x154   : > { %v507_v47 = vsel %vm425_vm4, %v1514_v25, %v1515_v43  ;;  %v508_v49 = vsel %vm425_vm4, %v1515_v43, %v1500_v30  ;;  %v506_v51 = vsel %vm425_vm4, %v1520_v42, %v1514_v25  ;;  %v446_v42 = vld [vmem:[%s2310_s1] sm:$0xf]  ;;  %v517_v43 = vsel %vm425_vm4, %v2047_v4, %v2045_v63 }
 0x155   : > { %v1528_v2 = vpop.permute.xlu1 %1527  ;;  %v1286_v10 = vpack.c.bf16 %v507_v47, %v504_v46  ;;  %v1295_v53 = vpack.c.bf16 %v508_v49, %v505_v48  ;;  %v1288_v5 = vpack.c.bf16 %v506_v51, %v503_v50  ;;  %v510_v12 = vsel %vm425_vm4, %v1524_v19, %v1525_v44 }
 0x156   : > { %v1530_v57 = vunpack.i.h.bf16 %v1528_v2  ;;  %v1529_v58 = vunpack.i.l.bf16 %v1528_v2  ;;  %v1538_v60 = vpop.permute.xlu0 %1537  ;;  %v511_v15 = vsel %vm425_vm4, %v1525_v44, %v1504_v56  ;;  %v1309_v48 = vpack.c.bf16 %v882_v1, %v2063_v33 }
 0x157   : > { %v1540_v9 = vunpack.i.h.bf16 %v1538_v60  ;;  %v1539_v11 = vunpack.i.l.bf16 %v1538_v60  ;;  %1287 = vmatprep.subr.bf16.mxu0 %v1286_v10  ;;  %1296 = vmatpush3.bf16.msra.mxu1 %v1295_v53  ;;  %v884_v47 = vsel %vm429_vm2, %v824_v22, %v839_v21 }
 0x158   : > { %1289 = vmatpush1.bf16.msra.mxu0 %v1288_v5  ;;  %1297 = vmatprep.subr.bf16.mxu1 %v1670_v20  ;;  %v513_v14 = vsel %vm425_vm4, %v1529_v58, %v1530_v57  ;;  %v514_v16 = vsel %vm425_vm4, %v1530_v57, %v1505_v54  ;;  %v889_v5 = vld [vmem:[%s2313_s4] sm:$0xf] }
 0x159   : > { %v1533_v17 = vpop.permute.xlu1 %1532  ;;  %v1290_v18 = vpack.c.bf16 %v513_v14, %v510_v12  ;;  %v1298_v26 = vpack.c.bf16 %v514_v16, %v511_v15  ;;  %v509_v27 = vsel %vm425_vm4, %v1539_v11, %v1524_v19  ;;  %v512_v28 = vsel %vm425_vm4, %v1540_v9, %v1529_v58 }
 0x15a   : > { %v1535_v24 = vunpack.i.h.bf16 %v1533_v17  ;;  %v1534_v62 = vunpack.i.l.bf16 %v1533_v17  ;;  %v1543_v36 = vpop.permute.xlu0 %1542  ;;  %v1292_v37 = vpack.c.bf16 %v512_v28, %v509_v27  ;;  %v515_v19 = vsel %vm425_vm4, %v2049_v7, %v2059_v32 }
 0x15b   : > { %1291 = vmatprep.subr.bf16.mxu0 %v1290_v18  ;;  %1299 = vmatpush3.bf16.msra.mxu1 %v1298_v26  ;;  %v1545_v30 = vunpack.i.h.bf16 %v1543_v36  ;;  %v1544_v38 = vunpack.i.l.bf16 %v1543_v36  ;;  %vm733_vm4 = vcmask 130048  }
 0x15c   : > { %1293 = vmatpush1.bf16.msra.mxu0 %v1292_v37  ;;  %1268 = vmatprep.subr.mxu1 %v1671_v45  ;;  %v864_v34 = vsel %vm862_vm15, %v1534_v62, %v1535_v24  ;;  %v888_v46 = vsel %vm429_vm2, %v1495_v6, %v1535_v24 }
 0x15d   : > { %v1548_v8 = vpop.permute.xlu1 %1547  ;;  %1231 = vmatprep.subr.msk.mxu0 %vm429_vm2, %v516_v29  ;;  %v887_v35 = vsel %vm429_vm2, %v852_v39, %v864_v34  ;;  %v825_v63 = vsel %vm822_vm13, %v1485_v3, %v1545_v30  ;;  %v823_v32 = vsel %vm822_vm13, %v1544_v38, %v1484_v23 }
 0x15e   : > { %v1550_v25 = vunpack.i.h.bf16 %v1548_v8  ;;  %v1549_v40 = vunpack.i.l.bf16 %v1548_v8  ;;  %v845_v44 = vpop.permute.xlu0 %844  ;;  %v1304_v3 = vpack.c.bf16 %v887_v35, %v884_v47 }
 0x15f   : > { %1269 = vmatpush3.msk.msra.mxu1 %vm429_vm2, %v517_v43  ;;  %v851_v61 = vsel %vm850_vm0, %v845_v44, %v1494_v13 }
 0x160   : > { %v840_v4 = vsel %vm837_vm14, %v1490_v0, %v1550_v25  ;;  %v838_v7 = vsel %vm837_vm14, %v1549_v40, %v1489_v52  ;;  %1232 = vmatpush1.msk.msra.mxu0 %vm429_vm2, %v515_v19  ;;  %1271 = vmatmul.mubr.msk.f32.vlgmr.msra.gmra.mrb[0].mxu1 %vm530_vm1, %v446_v42 }
 0x161   : > { %1308 = vmatprep.subr.bf16.mxu1 %v1670_v20  ;;  %v857_v33 = vpop.permute.xlu1 %856  ;;  %1233 = vmatmul.mubr.msk.f32.vlgmr.msra.gmra.mrb[0].mxu0 %vm530_vm1, %v446_v42  ;;  %v885_v0 = vsel %vm429_vm2, %v825_v63, %v840_v4  ;;  %v883_v59 = vsel %vm429_vm2, %v823_v32, %v838_v7 }
 0x162   : > { %v863_v49 = vsel %vm862_vm15, %v857_v33, %v1534_v62  ;;  %1301 = vmatprep.subr.bf16.mxu0 %v1300_v41  ;;  %1310 = vmatpush3.bf16.msra.mxu1 %v1309_v48  ;;  %v1312_v50 = vpack.c.bf16 %v888_v46, %v885_v0  ;;  %v871_v51 = vpop.permute.xlu0 %870 }
 0x163   : > { %v886_v23 = vsel %vm429_vm2, %v851_v61, %v863_v49  ;;  %1303 = vmatpush1.bf16.msra.mxu0 %v1302_v55  ;;  %1311 = vmatprep.subr.bf16.mxu1 %v1670_v20 }
 0x164   : > { %v1306_v52 = vpack.c.bf16 %v886_v23, %v883_v59  ;;  %1305 = vmatprep.subr.bf16.mxu0 %v1304_v3  ;;  %1283 = vmatprep.mubr.msk.f32.mxu1 %vm1672_vm9, %v1671_v45  ;;  %vm743_vm9 = vcmask 785408  }
 0x165   : > { %v873_v2 = vpop.permute.xlu1 %872  ;;  %963 = vmatprep.mubr.f32.mxu0 %v1671_v45 }
 0x166   : > { %1313 = vmatpush3.bf16.msra.mxu1 %v1312_v50  ;;  %v876_v10 = vsel %vm874_vm3, %v871_v51, %v873_v2  ;;  %v869_v53 = vpop.permute.xlu0 %868 }
 0x167   : > { %1307 = vmatpush1.bf16.msra.mxu0 %v1306_v52  ;;  %1281 = vmatprep.subr.mxu1 %v1671_v45  ;;  %v875_v20 = vsel %vm874_vm3, %v869_v53, %v871_v51 }
 0x168   : > { %1236 = vmatprep.subr.msk.mxu0 %vm429_vm2, %v876_v10 }
 0x16a   : > { %1282 = vmatpush3.msk.msra.mxu1 %vm429_vm2, %v873_v2 }
 0x16b   : > { %1284 = vmatmul.mubr.msk.f32.vlgmr.msra.gmra.mrb[2].mxu1 %vm530_vm1, %v889_v5  ;;  %1237 = vmatpush1.msk.msra.mxu0 %vm429_vm2, %v875_v20 }
 0x16c   : > { %1238 = vmatmul.mubr.msk.f32.vlgmr.msra.gmra.mrb[2].mxu0 %vm530_vm1, %v889_v5 }
 0x176   : > { %v2207_v13 = vpop.permute.xlu1 %765 }
 0x177   : > { %v2203_v11 = vpop.permute.xlu0 %1108 }
 0x17b   : > { %v2205_v12 = vpop.permute.xlu0 %757 }
 0x17f   : > { %v2209_v14 = vpop.permute.xlu0 %1116 }
 0x233   : > { %v677_v54 = vpop.f32.mrb[0].mxu1 }
 0x234   : > { %716 = vrot.lane.b32.xlu1 %v677_v54, %s1666_s16  ;;  %v2176_v56 = vpop.f32.mrb[0].mxu0  ;;  %v1272_v45 = vpop.f32.mrb[1].mxu1 }
 0x235   : > { %685 = vrot.lane.b32.xlu0 %v2176_v56, %s1676_s19  ;;  %v608_v57 = vpop.f32.mrb[1].mxu0 }
 0x238   : > { %721 = vrot.lane.b32.xlu1 %v677_v54, %s1668_s12 }
 0x239   : > { %688 = vrot.lane.b32.xlu0 %v2176_v56, %s2319_s9  ;;  %s1685_s9 = smov 38  }
 0x23c   : > { %724 = vrot.lane.b32.xlu1 %v677_v54, %s1678_s23 }
 0x23d   : > { %691 = vrot.lane.b32.xlu0 %v2176_v56, %s1660_s17 }
 0x23e   : > { %v1036_v58 = vpop.f32.mrb[2].mxu1 }
 0x23f   : > { %v1285_v60 = vpop.f32.mrb[3].mxu1  ;;  %v2185_v6 = vpop.f32.mrb[2].mxu0 }
 0x240   : > { %682 = vrot.lane.b32.xlu1 %v2176_v56, %s1664_s21  ;;  %v967_v9 = vpop.f32.mrb[3].mxu0 }
 0x241   : > { %694 = vrot.lane.b32.xlu0 %v2176_v56, %s1679_s20 }
 0x244   : > { %707 = vrot.lane.b32.xlu1 %v608_v57, %s1680_s22 }
 0x245   : > { %704 = vrot.lane.b32.xlu0 %v608_v57, %s1681_s11 }
 0x248   : > { %710 = vrot.lane.b32.xlu1 %v608_v57, %s1682_s29 }
 0x249   : > { %714 = vrot.lane.b32.xlu0 %v608_v57, %s1666_s16 }
 0x24c   : > { %1075 = vrot.lane.b32.xlu1 %v1036_v58, %s1666_s16 }
 0x24d   : > { %698 = vrot.lane.b32.xlu0 %v608_v57, %s1683_s18 }
 0x250   : > { %1079 = vrot.lane.b32.xlu1 %v1036_v58, %s1668_s12  ;;  %s1686_s12 = smov 86  }
 0x251   : > { %1050 = vrot.lane.b32.xlu0 %v2185_v6, %s1660_s17  ;;  %s2327_s17 = smov 110  }
 0x254   : > { %1082 = vrot.lane.b32.xlu1 %v1036_v58, %s1678_s23 }
 0x255   : > { %1053 = vrot.lane.b32.xlu0 %v2185_v6, %s1679_s20 }
 0x258   : > { %1085 = vrot.lane.b32.xlu1 %v1036_v58, %s1684_s15 }
 0x259   : > { %1063 = vrot.lane.b32.xlu0 %v967_v9, %s1681_s11  ;;  %s1138_s11 = scalar_lea.sflag [#allocation4], %s1833_s8 }
 0x25c   : > { %1088 = vrot.lane.b32.xlu1 %v1036_v58, %s1685_s9 }
 0x25d   : > { %1073 = vrot.lane.b32.xlu0 %v967_v9, %s1666_s16 }
 0x260   : > { %1041 = vrot.lane.b32.xlu1 %v2185_v6, %s1664_s21  ;;  %s2328_s21 = sshll.u32 %s1833_s8, 4 }
 0x261   : > { %1057 = vrot.lane.b32.xlu0 %v967_v9, %s1683_s18  ;;  %s294_s16 = scalar_lea.vmem [#allocation5], %s2328_s21 }
 0x264   : > { %1044 = vrot.lane.b32.xlu1 %v2185_v6, %s1676_s19  ;;  %s1247_s19 = sshll.u32 %s1749_s28, 8 }
 0x265   : > { %1060 = vrot.lane.b32.xlu0 %v967_v9, %s1686_s12 }
 0x268   : > { %1047 = vrot.lane.b32.xlu1 %v2185_v6, %s2327_s17 }
 0x269   : > { %701 = vrot.lane.b32.xlu0 %v608_v57, %s1686_s12 }
 0x26c   : > { %1066 = vrot.lane.b32.xlu1 %v967_v9, %s1680_s22  ;;  %s2264_s22 = scalar_lea.hbm %s2316_s7, %s1247_s19 }
 0x270   : > { %1069 = vrot.lane.b32.xlu1 %v967_v9, %s1682_s29  ;;  %s1687_s29 = smov [#allocation5]  }
 0x271   : > { %s1591_s18 = sshll.u32 %s1687_s29, 4  ;;  %s1592_s18 = int_to_ptr.vmem [resolvable:$false] %s1591_s18 }
 0x274   : > { %727 = vrot.lane.b32.xlu1 %v677_v54, %s1684_s15  ;;  %s1593_s15 = scalar_lea.vmem %s1592_s18, 512 }
 0x278   : > { %730 = vrot.lane.b32.xlu1 %v677_v54, %s1685_s9  ;;  %s1152_s9 = sshll.u32 %s294_s16, 4  ;;  %s2266_s9 = int_to_ptr.vmem [resolvable:$true] %s1152_s9 }
 0x279   : > { %s1587_s28 = scalar_lea.vmem %s2266_s9, 256  ;;  %p1594_p7 = scmp.lt.s32.totalorder %s2266_s9, %s1592_s18 }
 0x27a   : > { %p1588_p6 = scmp.ne.s32.totalorder %s2266_s9, %s1587_s28  ;;  %p1595_p10 = scmp.lt.s32.totalorder %s1593_s15, %s1587_s28 }
 0x27c   : > { %p1589_p12 = pnand %p1588_p6, %p2329_p11  ;;  %p1596_p2 = por %p1595_p10, %p1594_p7 }
 0x27e   : > { %p1590_p13 = pneg %p1589_p12 }
 0x280   : > { %p1597_p4 = pnand %p1596_p2, %p1590_p13 }
 0x2a6   : > { %v717_v15 = vpop.permute.xlu1 %716 }
 0x2a7   : > { %v686_v16 = vpop.permute.xlu0 %685 }
 0x2aa   : > { %v2211_v17 = vpop.permute.xlu1 %721 }
 0x2ab   : > { %v689_v18 = vpop.permute.xlu0 %688 }
 0x2ae   : > { %v2213_v26 = vpop.permute.xlu1 %724 }
 0x2af   : > { %v692_v27 = vpop.permute.xlu0 %691 }
 0x2b2   : > { %v683_v28 = vpop.permute.xlu1 %682 }
 0x2b3   : > { %v695_v31 = vpop.permute.xlu0 %694  ;;  %v734_v38 = vsel %vm733_vm4, %v2176_v56, %v683_v28 }
 0x2b4   : > { %v736_v42 = vsel %vm735_vm5, %v734_v38, %v686_v16 }
 0x2b5   : > { %v738_v40 = vsel %vm737_vm6, %v736_v42, %v689_v18 }
 0x2b6   : > { %v708_v24 = vpop.permute.xlu1 %707  ;;  %v740_v35 = vsel %vm739_vm7, %v738_v40, %v692_v27 }
 0x2b7   : > { %v705_v62 = vpop.permute.xlu0 %704  ;;  %v742_v48 = vsel %vm741_vm8, %v740_v35, %v695_v31 }
 0x2b8   : > { %v747_v51 = vsel %vm733_vm4, %v705_v62, %v708_v24 }
 0x2ba   : > { %v711_v36 = vpop.permute.xlu1 %710 }
 0x2bb   : > { %v715_v37 = vpop.permute.xlu0 %714  ;;  %v748_v23 = vsel %vm735_vm5, %v747_v51, %v711_v36 }
 0x2bc   : > { %v719_v52 = vsel %vm718_vm12, %v715_v37, %v717_v15 }
 0x2bd   : > { %v749_v54 = vsel %vm737_vm6, %v748_v23, %v719_v52 }
 0x2be   : > { %v1076_v22 = vpop.permute.xlu1 %1075  ;;  %v750_v15 = vsel %vm739_vm7, %v749_v54, %v2211_v17 }
 0x2bf   : > { %v699_v41 = vpop.permute.xlu0 %698  ;;  %v751_v36 = vsel %vm741_vm8, %v750_v15, %v2213_v26 }
 0x2c0   : > { %v744_v4 = vsel %vm743_vm9, %v742_v48, %v699_v41 }
 0x2c2   : > { %v1080_v1 = vpop.permute.xlu1 %1079 }
 0x2c3   : > { %v1051_v21 = vpop.permute.xlu0 %1050 }
 0x2c6   : > { %v1083_v29 = vpop.permute.xlu1 %1082 }
 0x2c7   : > { %v1054_v30 = vpop.permute.xlu0 %1053 }
 0x2ca   : > { %v1086_v34 = vpop.permute.xlu1 %1085 }
 0x2cb   : > { %v1064_v55 = vpop.permute.xlu0 %1063 }
 0x2ce   : > { %v1089_v8 = vpop.permute.xlu1 %1088 }
 0x2cf   : > { %v1074_v39 = vpop.permute.xlu0 %1073 }
 0x2d0   : > { %v1077_v56 = vsel %vm718_vm12, %v1074_v39, %v1076_v22 }
 0x2d2   : > { %v1042_v43 = vpop.permute.xlu1 %1041 }
 0x2d3   : > { %v1058_v25 = vpop.permute.xlu0 %1057  ;;  %v1091_v46 = vsel %vm733_vm4, %v2185_v6, %v1042_v43 }
 0x2d6   : > { %v1045_v44 = vpop.permute.xlu1 %1044 }
 0x2d7   : > { %v1061_v19 = vpop.permute.xlu0 %1060  ;;  %v1092_v47 = vsel %vm735_vm5, %v1091_v46, %v1045_v44 }
 0x2da   : > { %v1048_v63 = vpop.permute.xlu1 %1047 }
 0x2db   : > { %v1093_v7 = vsel %vm737_vm6, %v1092_v47, %v1048_v63  ;;  %v702_v32 = vpop.permute.xlu0 %701 }
 0x2dc   : > { %v1094_v33 = vsel %vm739_vm7, %v1093_v7, %v1051_v21  ;;  %v746_v3 = vsel %vm745_vm10, %v744_v4, %v702_v32 }
 0x2dd   : > { %v1095_v0 = vsel %vm741_vm8, %v1094_v33, %v1054_v30  ;;  %v760_v61 = vmul.f32 %v2205_v12, %v746_v3 }
 0x2de   : > { %v1096_v49 = vsel %vm743_vm9, %v1095_v0, %v1058_v25  ;;  %v1067_v50 = vpop.permute.xlu1 %1066 }
 0x2df   : > { %v1097_v59 = vsel %vm745_vm10, %v1096_v49, %v1061_v19  ;;  %v768_v10 = vadd.f32 %v2207_v13, %v760_v61  ;;  %v1098_v5 = vsel %vm733_vm4, %v1064_v55, %v1067_v50 }
 0x2e0   : > { %v1111_v2 = vmul.f32 %v2203_v11, %v1097_v59 }
 0x2e1   : > { %v772_v58 = vmul.f32 0.2, %v768_v10  ;;  %vm770_vm13 = vcmp.ge.f32.partialorder %v768_v10, 0.0 }
 0x2e2   : > { %v1119_v53 = vadd.f32 %v2209_v14, %v1111_v2  ;;  %v1070_v20 = vpop.permute.xlu1 %1069 }
 0x2e3   : > { %v1099_v45 = vsel %vm735_vm5, %v1098_v5, %v1070_v20  ;;  %v774_v31 = vsel %vm770_vm13, %v768_v10, %v772_v58 }
 0x2e4   : > { %vm1121_vm11 = vcmp.ge.f32.partialorder %v1119_v53, 0.0  ;;  %v1123_v57 = vmul.f32 0.2, %v1119_v53  ;;  %v1100_v60 = vsel %vm737_vm6, %v1099_v45, %v1077_v56 }
 0x2e5   : > { %v1101_v6 = vsel %vm739_vm7, %v1100_v60, %v1080_v1 }
 0x2e6   : > { %v1102_v9 = vsel %vm741_vm8, %v1101_v6, %v1083_v29  ;;  %v728_v16 = vpop.permute.xlu1 %727  ;;  %v1125_v18 = vsel %vm1121_vm11, %v1119_v53, %v1123_v57 }
 0x2e7   : > { %v1103_v27 = vsel %vm743_vm9, %v1102_v9, %v1086_v34  ;;  %v1129_v28 = vrot.slane %v1125_v18, 4  ;;  %v752_v22 = vsel %vm743_vm9, %v751_v36, %v728_v16 }
 0x2e8   : > { %v1104_v24 = vsel %vm745_vm10, %v1103_v27, %v1089_v8 }
 0x2e9   : > { %v1112_v62 = vmul.f32 %v2203_v11, %v1104_v24  ;;  %v1133_v37 = vsel %vm429_vm2, %v774_v31, %v1129_v28 }
 0x2ea   : > { %v731_v41 = vpop.permute.xlu1 %730  ;;  %1135 = vst [vmem:[%s294_s16] sm:$0xff] %v1133_v37 }
 0x2eb   : > { %v1120_v17 = vadd.f32 %v2209_v14, %v1112_v62  ;;  %v753_v1 = vsel %vm745_vm10, %v752_v22, %v731_v41 }
 0x2ec   : > { %v761_v21 = vmul.f32 %v2205_v12, %v753_v1 }
 0x2ed   : > { %vm1122_vm12 = vcmp.ge.f32.partialorder %v1120_v17, 0.0  ;;  %v1124_v11 = vmul.f32 0.2, %v1120_v17 }
 0x2ee   : > { %v769_v26 = vadd.f32 %v2207_v13, %v761_v21 }
 0x2ef   : > { %v1126_v29 = vsel %vm1122_vm12, %v1120_v17, %v1124_v11 }
 0x2f0   : > { %vm771_vm14 = vcmp.ge.f32.partialorder %v769_v26, 0.0  ;;  %v773_v30 = vmul.f32 0.2, %v769_v26  ;;  %v1130_v34 = vrot.slane %v1126_v29, 4 }
 0x2f2   : > { %v775_v55 = vsel %vm771_vm14, %v769_v26, %v773_v30 }
 0x2f3   : > { %v1134_v12 = vsel %vm429_vm2, %v775_v55, %v1130_v34 }
 0x2f4   : > { %1136 = vst [vmem:[%s294_s16 + $0x8] sm:$0xff] %v1134_v12 }
 0x2f5   : > { %1600 = shalt.err (!%p1597_p4)
}
 0x2f6   : > { %s1601_s8 = scalar_lea.hbm %s2264_s22, 256  ;;  %s1605_s21 = scalar_lea.hbm %s2316_s7, 512 }
 0x2f7   : > { %p1602_p5 = scmp.ne.s32.totalorder %s2264_s22, %s1601_s8  ;;  %p1606_p0 = scmp.lt.u32.totalorder %s2264_s22, %s2316_s7 }
 0x2f8   : > { %p1607_p1 = scmp.lt.u32.totalorder %s1605_s21, %s1601_s8  ;;  %p1609_p6 = scmp.lt.u32.totalorder %s1601_s8, %s2264_s22 }
 0x2f9   : > { %p1603_p8 = pnand %p1602_p5, %p2329_p11 }
 0x2fa   : > { %p1608_p3 = por %p1607_p1, %p1606_p0 }
 0x2fb   : > { %p1604_p9 = pneg %p1603_p8 }
 0x2fc   : > { %p1610_p12 = por %p1609_p6, %p1608_p3 }
 0x2fe   : > { %p1611_p13 = pnand %p1610_p12, %p1604_p9 }
 0x300   : > { %1614 = shalt.err (!%p1611_p13)
}
 0x301   : > { %1316 = dma.vmem_to_hbm [thread:$0]  (%p2329_p11), %s2266_s9, 256, %s2264_s22, %s1138_s11  }
 0x302 PF: > { %s1164_s23 = sand.u32 1, %s1641_s24   ;;  %p2330_p7 = scmp.ne.s32.totalorder %s2323_s14, 0 }
 0x303   : > { %p2331_p10 = scmp.ge.s32.totalorder %s1653_s27, 2  ;;  %s1165_s20 = scalar_lea.sflag [#allocation4], %s1164_s23 }
 0x305   : > { %p1323_p2 = pnand %p2331_p10, %p2330_p7 }
 0x307   : > { %1636 = dma.done.wait (!%p1323_p2), %s1165_s20, 256  }
 0x308   : > { %1638 = vsyncadd (!%p1323_p2), %s1165_s20, 4294967040  ;;  %p20_p4 = scmp.ge.s32.totalorder %s1753_s30, 4   ;;  %s2332_s24 = smov %s1645_s25 }
 0x309   : > { %s2333_s25 = smov %s1649_s26  ;;  %s2334_s26 = smov %s1765_s10 }
 0x30a   : > { %s2335_s27 = smov %s1753_s30  ;;  %22 = sbr.rel (!%p20_p4) target bundleno = 5 (0x5), region = 93 }
 0x311   :  { %1170 = vsyncpa [#allocation3], 1 }
 0x312   :  { %1172 = vsyncpa [#allocation3 + $0x1], 1 }
 0x313   :  { %1173 = vsyncpa [#allocation4], 1 }
 0x314   :  { %1175 = vsyncpa [#allocation4 + $0x1], 1 }

</bundles_post_ra>
